<compile_context>
chip_gen: v5e
topology: v5e:2x2
jax: 0.10.0
libtpu: 0.0.40
codegen_flags: <defaults>
</compile_context>

<pallas_src>
import functools

import jax
import jax.numpy as jnp
from jax import lax
from jax.experimental import pallas as pl
from jax.experimental.pallas import tpu as pltpu


def _round_up(x, m):
    return ((x + m - 1) // m) * m


# --------------------------------------------------------------------------
# Shared focal transform: loss = -(1 - pt)^gamma * (alpha_t * logpt)
# --------------------------------------------------------------------------
def _focal_from_logpt(logpt, pt, at, gamma):
    if at is not None:
        logpt = logpt * at
    if gamma == 0.0:
        return -logpt
    if float(gamma).is_integer():
        mod = lax.integer_pow(1.0 - pt, int(gamma))
    else:
        mod = jnp.power(jnp.maximum(1.0 - pt, 0.0), gamma)
    return -mod * logpt


# --------------------------------------------------------------------------
# Kernel A: channels on sublanes, batch/spatial on lanes.  x_ref: (C, TS)
# --------------------------------------------------------------------------
def _focal_channels_kernel(x_ref, tgt_ref, *rest, gamma, s_valid, ts, has_alpha):
    if has_alpha:
        at_ref, out_ref = rest
    else:
        (out_ref,) = rest

    x = x_ref[...]                                   # (C, TS), input dtype
    tgt = tgt_ref[...]                               # (1, TS) int32
    c, t = x.shape

    m = jnp.max(x, axis=0, keepdims=True)            # (1, TS)
    z = x - m                                        # input dtype (bf16 stays bf16)
    # exp / logsumexp in f32 (EUP path); only transient f32 materialization.
    lse = jnp.log(jnp.sum(jnp.exp(z.astype(jnp.float32)), axis=0, keepdims=True))

    onehot = lax.broadcasted_iota(jnp.int32, (c, t), 0) == tgt          # (C, TS)
    z_t = jnp.sum(jnp.where(onehot, z, jnp.zeros_like(z)),
                  axis=0, keepdims=True).astype(jnp.float32)            # (1, TS)

    logpt = z_t - lse                                # (1, TS) f32
    pt = jnp.exp(logpt)
    at = at_ref[...].astype(jnp.float32) if has_alpha else None
    loss = _focal_from_logpt(logpt, pt, at, gamma)   # (1, TS)

    # Mask boundary-block lanes (grid need not divide S; OOB reads are garbage).
    col = pl.program_id(1) * ts + lax.broadcasted_iota(jnp.int32, (1, t), 1)
    loss = jnp.where(col < s_valid, loss, 0.0)

    out_ref[...] = jnp.full((1, 128), jnp.sum(loss), jnp.float32)


# --------------------------------------------------------------------------
# Kernel B: rows on sublanes, classes on lanes (used for 2-D inputs, C >= 128).
# --------------------------------------------------------------------------
def _focal_rows_kernel(x_ref, tgt_ref, *rest, gamma, n_valid, tb, has_alpha):
    if has_alpha:
        at_ref, out_ref = rest
    else:
        (out_ref,) = rest

    x = x_ref[...]                                   # (TB, C)
    tgt = tgt_ref[...]                               # (TB, 1) int32
    r, c = x.shape

    m = jnp.max(x, axis=1, keepdims=True)            # (TB, 1)
    z = x - m
    lse = jnp.log(jnp.sum(jnp.exp(z.astype(jnp.float32)), axis=1, keepdims=True))

    onehot = lax.broadcasted_iota(jnp.int32, (r, c), 1) == tgt
    z_t = jnp.sum(jnp.where(onehot, z, jnp.zeros_like(z)),
                  axis=1, keepdims=True).astype(jnp.float32)

    logpt = z_t - lse                                # (TB, 1)
    pt = jnp.exp(logpt)
    at = at_ref[...].astype(jnp.float32) if has_alpha else None
    loss = _focal_from_logpt(logpt, pt, at, gamma)   # (TB, 1)

    row = pl.program_id(0) * tb + lax.broadcasted_iota(jnp.int32, (r, 1), 0)
    loss = jnp.where(row < n_valid, loss, 0.0)

    out_ref[...] = jnp.full((1, 128), jnp.sum(loss), jnp.float32)


# --------------------------------------------------------------------------
# Helpers
# --------------------------------------------------------------------------
def _make_alpha_vec(alpha, num_classes):
    """Replicates the PyTorch constructor's alpha handling as a (C,) f32 vector."""
    if alpha is None:
        return None
    if isinstance(alpha, (float, int)):
        a = jnp.array([float(alpha), 1.0 - float(alpha)], jnp.float32)
    else:
        a = jnp.asarray(alpha, jnp.float32).reshape(-1)
    if a.shape[0] < num_classes:
        # NOTE: PyTorch's gather would raise for classes >= len(alpha); we pad
        # with 1.0 (no reweight) instead of faking an error.
        a = jnp.concatenate(
            [a, jnp.ones((num_classes - a.shape[0],), jnp.float32)])
    else:
        a = a[:num_classes]
    return a


def _pick_lane_block(s, c, itemsize, num_batch, override=None):
    """Lane (spatial/batch) tile: ~2 MiB of logits per buffer, multiple of 128."""
    if override is not None:
        ts = min(int(override), s)
    else:
        target = 2 * 1024 * 1024
        ts = target // max(c * itemsize, 1)
        ts = max(128, min(ts, 16384))
        # Keep >= 2 tiles total so both v7x TensorCores get work.
        if num_batch == 1 and ts >= s and s > 256:
            ts = pl.cdiv(s, 2)
    if ts >= s:
        return s                                   # full extent: always legal
    ts = _round_up(ts, 128)
    return s if ts >= s else ts


def _pick_row_block(n, c, itemsize, override=None):
    """Row tile for the (N, C) layout: ~2 MiB per buffer, multiple of 8."""
    if override is not None:
        tb = min(int(override), n)
    else:
        target = 2 * 1024 * 1024
        tb = target // max(c * itemsize, 1)
        tb = max(8, min(tb, 4096))
        if tb >= n and n > 512:
            tb = pl.cdiv(n, 2)                     # >= 2 tiles for v7x
    if tb >= n:
        return n
    tb = _round_up(tb, 8)
    return n if tb >= n else tb


_VMEM_LIMIT = 32 * 1024 * 1024   # within v7x scoped default, raises v5e's 16 MiB


# --------------------------------------------------------------------------
# Drivers
# --------------------------------------------------------------------------
def _focal_channels(x, tgt, gamma, alpha, size_average, lane_block):
    """x: (B, C, S) logits (native layout), tgt: (B, 1, S) int32."""
    b, c, s = x.shape
    n = b * s
    alpha_vec = _make_alpha_vec(alpha, c)
    has_alpha = alpha_vec is not None

    ts = _pick_lane_block(s, c, x.dtype.itemsize, b, lane_block)
    gs = pl.cdiv(s, ts)

    args = [x, tgt]
    in_specs = [
        pl.BlockSpec((None, c, ts), lambda i, j: (i, 0, j)),   # logits tile
        pl.BlockSpec((None, 1, ts), lambda i, j: (i, 0, j)),   # targets tile
    ]
    if has_alpha:
        at = alpha_vec[tgt]                                    # (B, 1, S) f32
        args.append(at)
        in_specs.append(pl.BlockSpec((None, 1, ts), lambda i, j: (i, 0, j)))

    kernel = functools.partial(_focal_channels_kernel, gamma=float(gamma),
                               s_valid=s, ts=ts, has_alpha=has_alpha)

    partials = pl.pallas_call(
        kernel,
        out_shape=jax.ShapeDtypeStruct((b, gs, 1, 128), jnp.float32),
        grid_spec=pltpu.PrefetchScalarGridSpec(
            num_scalar_prefetch=0,
            grid=(b, gs),
            in_specs=in_specs,
            out_specs=pl.BlockSpec((None, None, 1, 128),
                                   lambda i, j: (i, j, 0, 0)),
        ),
        compiler_params=pltpu.CompilerParams(
            dimension_semantics=("parallel", "parallel"),
            vmem_limit_bytes=_VMEM_LIMIT,
        ),
        cost_estimate=pl.CostEstimate(
            flops=8 * n * c,
            transcendentals=n * (c + 2),
            bytes_accessed=n * c * x.dtype.itemsize + 8 * n),
    )(*args)

    total = jnp.sum(partials[:, :, 0, 0])
    if size_average:
        total = total / jnp.float32(n)
    return total


def _focal_rows(x, tgt, gamma, alpha, size_average, row_block):
    """x: (N, C) logits, tgt: (N, 1) int32 — used when C >= 128 (lanes full)."""
    n, c = x.shape
    alpha_vec = _make_alpha_vec(alpha, c)
    has_alpha = alpha_vec is not None

    tb = _pick_row_block(n, c, x.dtype.itemsize, row_block)
    g = pl.cdiv(n, tb)

    args = [x, tgt]
    in_specs = [pl.BlockSpec((tb, c), lambda i: (i, 0)),
                pl.BlockSpec((tb, 1), lambda i: (i, 0))]
    if has_alpha:
        at = alpha_vec[tgt]                                    # (N, 1) f32
        args.append(at)
        in_specs.append(pl.BlockSpec((tb, 1), lambda i: (i, 0)))

    kernel = functools.partial(_focal_rows_kernel, gamma=float(gamma),
                               n_valid=n, tb=tb, has_alpha=has_alpha)

    partials = pl.pallas_call(
        kernel,
        out_shape=jax.ShapeDtypeStruct((g, 1, 128), jnp.float32),
        grid_spec=pltpu.PrefetchScalarGridSpec(
            num_scalar_prefetch=0,
            grid=(g,),
            in_specs=in_specs,
            out_specs=pl.BlockSpec((None, 1, 128), lambda i: (i, 0, 0)),
        ),
        compiler_params=pltpu.CompilerParams(
            dimension_semantics=("parallel",),
            vmem_limit_bytes=_VMEM_LIMIT,
        ),
        cost_estimate=pl.CostEstimate(
            flops=8 * n * c,
            transcendentals=n * (c + 2),
            bytes_accessed=n * c * x.dtype.itemsize + 8 * n),
    )(*args)

    total = jnp.sum(partials[:, 0, 0])
    if size_average:
        total = total / jnp.float32(n)
    return total


def focal_loss(inputs, target, gamma=0.0, alpha=None, size_average=True,
               lane_block=None, row_block=None):
    """Focal loss forward. inputs: (N, C) or (B, C, *spatial); target: int classes."""
    x = inputs
    if x.ndim > 2:
        b, c = x.shape[0], x.shape[1]
        s = 1
        for d in x.shape[2:]:
            s *= d
        x3 = x.reshape(b, c, s)                          # free reshape, NO transpose
        tgt3 = target.reshape(b, 1, s).astype(jnp.int32)
        return _focal_channels(x3, tgt3, gamma, alpha, size_average, lane_block)

    n, c = x.shape
    tgt = target.reshape(-1).astype(jnp.int32)
    if c < 128:
        # Tiny class count: put batch on lanes, classes on sublanes.
        x3 = jnp.transpose(x, (1, 0)).reshape(1, c, n)
        return _focal_channels(x3, tgt.reshape(1, 1, n), gamma, alpha,
                               size_average, lane_block)
    return _focal_rows(x, tgt.reshape(n, 1), gamma, alpha, size_average,
                       row_block)


# --------------------------------------------------------------------------
# Pure-JAX reference (mirrors the PyTorch module) + self-test
# --------------------------------------------------------------------------
def _reference(inputs, target, gamma, alpha, size_average):
    x = inputs
    if x.ndim > 2:
        b, c = x.shape[0], x.shape[1]
        x = x.reshape(b, c, -1)
        x = jnp.transpose(x, (0, 2, 1)).reshape(-1, c)
    x = x.astype(jnp.float32)
    t = target.reshape(-1).astype(jnp.int32)
    logp = jax.nn.log_softmax(x, axis=1)
    logpt = jnp.take_along_axis(logp, t[:, None], axis=1)[:, 0]
    pt = jnp.exp(logpt)
    if alpha is not None:
        if isinstance(alpha, (float, int)):
            a = jnp.array([float(alpha), 1.0 - float(alpha)], jnp.float32)
        else:
            a = jnp.asarray(alpha, jnp.float32)
        logpt = logpt * a[t]
    loss = -((1.0 - pt) ** gamma) * logpt
    return jnp.mean(loss) if size_average else jnp.sum(loss)


if __name__ == "__main__":
    key = jax.random.PRNGKey(0)
    ks = jax.random.split(key, 8)

    # Case 1: (B, C, H, W) logits consumed in native channel layout, gamma=2,
    # per-class alpha, mean reduction.
    B, C, H, W = 2, 4, 16, 16
    x4 = jax.random.normal(ks[0], (B, C, H, W), dtype=jnp.float32)
    t4 = jax.random.randint(ks[1], (B, H, W), 0, C)
    alpha_list = [0.1, 0.2, 0.3, 0.4]
    out1 = jax.block_until_ready(
        focal_loss(x4, t4, gamma=2.0, alpha=alpha_list, size_average=True))
    ref1 = _reference(x4, t4, 2.0, alpha_list, True)
    assert jnp.allclose(out1, ref1, rtol=1e-5, atol=1e-5), (out1, ref1)

    # Case 2: 2-D binary classification (C<128 -> lane layout), scalar alpha,
    # gamma=0, sum reduction.
    N2, C2 = 21, 2
    x2 = jax.random.normal(ks[2], (N2, C2), dtype=jnp.float32)
    t2 = jax.random.randint(ks[3], (N2,), 0, C2)
    out2 = jax.block_until_ready(
        focal_loss(x2, t2, gamma=0.0, alpha=0.25, size_average=False))
    ref2 = _reference(x2, t2, 0.0, 0.25, False)
    assert jnp.allclose(out2, ref2, rtol=1e-5, atol=1e-5), (out2, ref2)

    # Case 3: bf16 logits (bf16 max/select in-kernel, f32 exp/logsumexp).
    xb = x4.astype(jnp.bfloat16)
    out3 = jax.block_until_ready(
        focal_loss(xb, t4, gamma=2.0, alpha=alpha_list, size_average=True))
    ref3 = _reference(xb.astype(jnp.float32), t4, 2.0, alpha_list, True)
    assert jnp.allclose(out3, ref3, rtol=3e-2, atol=3e-2), (out3, ref3)

    # Case 4: odd C, spatial extent not a multiple of the lane tile (exercises
    # the no-pad boundary-block masking), no alpha, non-integer gamma.
    B4, C4, H4, W4 = 2, 3, 9, 15
    x5 = jax.random.normal(ks[4], (B4, C4, H4, W4), dtype=jnp.float32)
    t5 = jax.random.randint(ks[5], (B4, H4, W4), 0, C4)
    out4 = jax.block_until_ready(
        focal_loss(x5, t5, gamma=1.5, alpha=None, size_average=True,
                   lane_block=128))
    ref4 = _reference(x5, t5, 1.5, None, True)
    assert jnp.allclose(out4, ref4, rtol=1e-5, atol=1e-5), (out4, ref4)

    # Case 5: 2-D with C >= 128 -> row-layout kernel, N not a multiple of the
    # row tile (boundary rows masked), per-class alpha, mean reduction.
    N5, C5 = 300, 128
    x6 = jax.random.normal(ks[6], (N5, C5), dtype=jnp.float32)
    t6 = jax.random.randint(ks[7], (N5,), 0, C5)
    alpha5 = [0.5 + 0.002 * i for i in range(C5)]
    out5 = jax.block_until_ready(
        focal_loss(x6, t6, gamma=2.0, alpha=alpha5, size_average=True,
                   row_block=128))
    ref5 = _reference(x6, t6, 2.0, alpha5, True)
    assert jnp.allclose(out5, ref5, rtol=1e-5, atol=1e-5), (out5, ref5)

    print("KERNEL_OK")
</pallas_src>

<mosaic_0001>
module attributes {stable_mosaic.version = 11 : i64} {
  func.func @_focal_channels_kernel(%arg0: i32, %arg1: i32, %arg2: memref<1x4x256xf32, #tpu.memory_space<vmem>>, %arg3: memref<1x1x256xi32, #tpu.memory_space<vmem>>, %arg4: memref<1x1x256xf32, #tpu.memory_space<vmem>>, %arg5: memref<1x1x1x128xf32, #tpu.memory_space<vmem>>) attributes {dimension_semantics = [#tpu.dimension_semantics<parallel>, #tpu.dimension_semantics<parallel>], iteration_bounds = array<i64: 2, 1>, scalar_prefetch = 0 : i64, scratch_operands = 0 : i64, tpu.core_type = #tpu.core_type<tc>, window_params = [{transform_indices = @transform_0, window_bounds = array<i64: 1, 4, 256>}, {transform_indices = @transform_1, window_bounds = array<i64: 1, 1, 256>}, {transform_indices = @transform_2, window_bounds = array<i64: 1, 1, 256>}, {transform_indices = @transform_3, window_bounds = array<i64: 1, 1, 1, 128>}]} {
    %c0 = arith.constant 0 : index
    %c0_0 = arith.constant 0 : index
    %c0_1 = arith.constant 0 : index
    %0 = vector.load %arg2[%c0, %c0_0, %c0_1] : memref<1x4x256xf32, #tpu.memory_space<vmem>>, vector<1x4x256xf32>
    %1 = vector.shape_cast %0 : vector<1x4x256xf32> to vector<4x256xf32>
    %c0_2 = arith.constant 0 : index
    %c0_3 = arith.constant 0 : index
    %c0_4 = arith.constant 0 : index
    %2 = vector.load %arg3[%c0_2, %c0_3, %c0_4] : memref<1x1x256xi32, #tpu.memory_space<vmem>>, vector<1x1x256xi32>
    %3 = vector.shape_cast %2 : vector<1x1x256xi32> to vector<1x256xi32>
    %cst = arith.constant dense<0xFF800000> : vector<256xf32>
    %4 = vector.multi_reduction <maximumf>, %1, %cst [0] : vector<4x256xf32> to vector<256xf32>
    %5 = vector.shape_cast %4 : vector<256xf32> to vector<1x256xf32>
    %6 = vector.broadcast %5 : vector<1x256xf32> to vector<4x256xf32>
    %7 = arith.subf %1, %6 : vector<4x256xf32>
    %8 = math.exp %7 : vector<4x256xf32>
    %cst_5 = arith.constant dense<0.000000e+00> : vector<256xf32>
    %9 = vector.multi_reduction <add>, %8, %cst_5 [0] : vector<4x256xf32> to vector<256xf32>
    %10 = vector.shape_cast %9 : vector<256xf32> to vector<1x256xf32>
    %11 = math.log %10 : vector<1x256xf32>
    %12 = tpu.iota {dimensions = array<i32: 0>} : vector<4x256xi32>
    %13 = vector.broadcast %3 : vector<1x256xi32> to vector<4x256xi32>
    %14 = arith.cmpi eq, %12, %13 : vector<4x256xi32>
    %cst_6 = arith.constant 0.000000e+00 : f32
    %15 = vector.broadcast %cst_6 : f32 to vector<4x256xf32>
    %16 = arith.select %14, %7, %15 : vector<4x256xi1>, vector<4x256xf32>
    %cst_7 = arith.constant dense<0.000000e+00> : vector<256xf32>
    %17 = vector.multi_reduction <add>, %16, %cst_7 [0] : vector<4x256xf32> to vector<256xf32>
    %18 = vector.shape_cast %17 : vector<256xf32> to vector<1x256xf32>
    %19 = arith.subf %18, %11 : vector<1x256xf32>
    %20 = math.exp %19 : vector<1x256xf32>
    %c0_8 = arith.constant 0 : index
    %c0_9 = arith.constant 0 : index
    %c0_10 = arith.constant 0 : index
    %21 = vector.load %arg4[%c0_8, %c0_9, %c0_10] : memref<1x1x256xf32, #tpu.memory_space<vmem>>, vector<1x1x256xf32>
    %22 = vector.shape_cast %21 : vector<1x1x256xf32> to vector<1x256xf32>
    %23 = arith.mulf %19, %22 : vector<1x256xf32>
    %cst_11 = arith.constant 1.000000e+00 : f32
    %24 = vector.broadcast %cst_11 : f32 to vector<1x256xf32>
    %25 = arith.subf %24, %20 : vector<1x256xf32>
    %26 = arith.mulf %25, %25 : vector<1x256xf32>
    %cst_12 = arith.constant 0.000000e+00 : f32
    %27 = vector.broadcast %cst_12 : f32 to vector<1x256xf32>
    %28 = arith.subf %27, %26 : vector<1x256xf32>
    %29 = arith.mulf %28, %23 : vector<1x256xf32>
    %c256_i32 = arith.constant 256 : i32
    %30 = arith.muli %arg1, %c256_i32 : i32
    %31 = tpu.iota {dimensions = array<i32: 1>} : vector<1x256xi32>
    %32 = vector.broadcast %30 : i32 to vector<1x256xi32>
    %33 = arith.addi %32, %31 : vector<1x256xi32>
    %c256_i32_13 = arith.constant 256 : i32
    %34 = vector.broadcast %c256_i32_13 : i32 to vector<1x256xi32>
    %35 = arith.cmpi slt, %33, %34 : vector<1x256xi32>
    %cst_14 = arith.constant 0.000000e+00 : f32
    %36 = vector.broadcast %cst_14 : f32 to vector<1x256xf32>
    %37 = arith.select %35, %29, %36 : vector<1x256xi1>, vector<1x256xf32>
    %38 = vector.shape_cast %37 : vector<1x256xf32> to vector<1x1x256xf32>
    %cst_15 = arith.constant dense<0.000000e+00> : vector<1xf32>
    %39 = vector.multi_reduction <add>, %38, %cst_15 [1, 2] : vector<1x1x256xf32> to vector<1xf32>
    %40 = vector.shape_cast %39 : vector<1xf32> to vector<1x1x1xf32>
    %41 = vector.extract %40[0, 0, 0] : f32 from vector<1x1x1xf32>
    %42 = vector.broadcast %41 : f32 to vector<1x128xf32>
    %c0_16 = arith.constant 0 : index
    %c0_17 = arith.constant 0 : index
    %c0_18 = arith.constant 0 : index
    %c0_19 = arith.constant 0 : index
    %43 = vector.load %arg5[%c0_16, %c0_17, %c0_18, %c0_19] : memref<1x1x1x128xf32, #tpu.memory_space<vmem>>, vector<1x1x1x128xf32>
    %44 = vector.shape_cast %43 : vector<1x1x1x128xf32> to vector<1x128xf32>
    %45 = vector.shape_cast %42 : vector<1x128xf32> to vector<1x1x1x128xf32>
    tpu.vector_store %arg5[%c0_16, %c0_17, %c0_18, %c0_19], %45 {strides = array<i32>} : memref<1x1x1x128xf32, #tpu.memory_space<vmem>>, vector<1x1x1x128xf32>,
    return
  }
  func.func @transform_0(%arg0: i32, %arg1: i32) -> (i32, i32, i32) {
    %c0_i32 = arith.constant 0 : i32
    %c0_i32_0 = arith.constant 0 : i32
    return %arg0, %c0_i32, %arg1 : i32, i32, i32
  }
  func.func @transform_1(%arg0: i32, %arg1: i32) -> (i32, i32, i32) {
    %c0_i32 = arith.constant 0 : i32
    %c0_i32_0 = arith.constant 0 : i32
    return %arg0, %c0_i32, %arg1 : i32, i32, i32
  }
  func.func @transform_2(%arg0: i32, %arg1: i32) -> (i32, i32, i32) {
    %c0_i32 = arith.constant 0 : i32
    %c0_i32_0 = arith.constant 0 : i32
    return %arg0, %c0_i32, %arg1 : i32, i32, i32
  }
  func.func @transform_3(%arg0: i32, %arg1: i32) -> (i32, i32, i32, i32) {
    %c0_i32 = arith.constant 0 : i32
    %c0_i32_0 = arith.constant 0 : i32
    %c0_i32_1 = arith.constant 0 : i32
    return %arg0, %arg1, %c0_i32, %c0_i32_0 : i32, i32, i32, i32
  }
}

</mosaic_0001>

<bundles_post_ra>
// kernel: tpu_custom_call.1
= control target key start
LH: loop header
LB: loop body
LE: loop exit
PB: predicated region body
PF: predicated region fallthrough
CT: control target
= control target key end

     0   :  { %s1028_s0 = inlined_call_operand.hbm [shape: f32[2,4,256], index: 0, kind: input, shape index: {}]   ;;  %s1029_s1 = inlined_call_operand.hbm [shape: s32[2,1,256], index: 1, kind: input, shape index: {}]   ;;  %s1030_s2 = inlined_call_operand.hbm [shape: f32[2,1,256], index: 2, kind: input, shape index: {}]   ;;  %s1031_s3 = inlined_call_operand.hbm [shape: f32[2,1,1,128], index: 3, kind: output, shape index: {}]  }
   0x1   :  { %1033 = sst [smem:[#allocation14_spill]] %s1029_s1 }
   0x2   :  { %8 = vsyncpa [#allocation3], 0 }
   0x3   :  { %10 = vsyncpa [#allocation3 + $0x1], 0 }
   0x4   :  { %11 = vsyncpa [#allocation6], 0 }
   0x5   :  { %13 = vsyncpa [#allocation6 + $0x1], 0 }
   0x6   :  { %14 = vsyncpa [#allocation4], 0 }
   0x7   :  { %16 = vsyncpa [#allocation4 + $0x1], 0  ;;  %s862_s12 = smov 0   ;;  %s864_s13 = smov 0  }
   0x8   :  { %s866_s14 = smov 0   ;;  %s868_s15 = smov 0  }
   0x9   :  { %s870_s16 = smov 0   ;;  %s872_s17 = smov 0  }
   0xa LB: > { %s893_s18 = sadd.s32 4294967295, %s840_s17   ;;  %s563_s19 = sadd.s32 4294967294, %s840_s17   ;;  %s840_s17 = sphi %s872_s17, %s22_s17   ;;  %s836_s16 = sphi %s870_s16, %s1049_s16   ;;  %s832_s15 = sphi %s868_s15, %s1048_s15   ;;  %s828_s14 = sphi %s866_s14, %s1047_s14   ;;  %s824_s13 = sphi %s864_s13, %s1046_s13   ;;  %s820_s12 = sphi %s862_s12, %s1045_s12  }
   0xb   : > { %s34_s20 = sadd.s32 1, %s836_s16  ;;  %s43_s21 = sadd.s32 1, %s828_s14 }
   0xc   : > { %p36_p0 = scmp.ge.s32.totalorder %s34_s20, 2  ;;  %p50_p1 = scmp.ne.s32.totalorder %s828_s14, %s824_s13 }
   0xd   : > { %p51_p2 = scmp.eq.s32.totalorder %s840_s17, 0  ;;  %p56_p3 = scmp.ne.s32.totalorder %s824_s13, %s820_s12 }
   0xe   : > { %s1051_s20 = smov (%p36_p0, %s34_s20), 0  ;;  %p57_p5 = scmp.eq.s32.totalorder %s893_s18, 0 }
   0xf   : > { %1034 = sst [smem:[#allocation12_spill]] %s1051_s20  ;;  %p905_p4 = por %p51_p2, %p50_p1 }
  0x10   : > { %s38_s23 = ssub.s32 %s836_s16, %s1051_s20  ;;  %p138_p6 = scmp.eq.s32.totalorder %s893_s18, 1 }
  0x11   : > { %p41_p7 = scmp.eq.s32.totalorder %s38_s23, 0  ;;  %p913_p8 = por %p57_p5, %p56_p3 }
  0x12   : > { %p917_p9 = por %p138_p6, %p50_p1  ;;  %p144_p10 = scmp.eq.s32.totalorder %s563_s19, 1 }
  0x13   : > { %s922_s26 = scalar_select %p41_p7, %s828_s14, %s43_s21  }
  0x14   : > { %p924_p11 = por %p144_p10, %p56_p3  ;;  %p565_p12 = scmp.ge.s32.totalorder %s840_s17, 2 }
  0x15   : > { %1038 = sst [smem:[#allocation13_spill]] %s922_s26  ;;  %p604_p13 = scmp.lt.s32.totalorder %s840_s17, 2 }
  0x16   : > { %s164_s28 = sand.u32 1, %s828_s14   ;;  %s186_s29 = sand.u32 1, %s840_s17  }
  0x17   : > { %s569_s30 = sshll.u32 %s164_s28, 1  ;;  %p934_p0 = pnand %p604_p13, %p905_p4 }
  0x18   : > { %s570_s5 = sshll.u32 %s836_s16, 1  ;;  %s1041_s1 = sld [smem:[#allocation14_spill]] }
  0x19   : > { %s190_s10 = scalar_lea.vmem [#allocation5], %s569_s30  ;;  %s187_s19 = scalar_lea.sflag [#allocation6], %s186_s29 }
  0x1a   : > { %s200_s11 = sshll.u32 %s190_s10, 4  ;;  %s217_s23 = scalar_lea.hbm %s1030_s2, %s570_s5  ;;  %s201_s11 = int_to_ptr.vmem [resolvable:$true] %s200_s11 }
  0x1b   : > { %p573_p1 = scmp.ge.s32.totalorder %s840_s17, 1  ;;  %p226_p2 = scmp.lt.s32.totalorder %s840_s17, 3 }
  0x1c   : > { %s566_s6 = sshll.u32 %s164_s28, 3  ;;  %s579_s7 = sshll.u32 %s836_s16, 3 }
  0x1d   : > { %p949_p3 = pnand %p573_p1, %p226_p2  ;;  %s168_s26 = scalar_lea.vmem [#allocation2], %s566_s6 }
  0x1e   : > { %s196_s8 = scalar_lea.hbm %s1041_s1, %s570_s5  ;;  %s175_s1 = scalar_lea.hbm %s1028_s0, %s579_s7 }
  0x1f   : > { %s198_s9 = sshll.u32 %s196_s8, 4  ;;  %s177_s29 = sshll.u32 %s175_s1, 4  ;;  %s199_s9 = int_to_ptr.hbm [resolvable:$true] %s198_s9  ;;  %s178_s29 = int_to_ptr.hbm [resolvable:$true] %s177_s29 }
  0x20   : > { %596 = dma.hbm_to_vmem [thread:$0]  (!%p934_p0), %s199_s9, 32, %s201_s11, %s187_s19  }
  0x21   : > { %s179_s9 = sshll.u32 %s168_s26, 4  ;;  %s165_s11 = scalar_lea.sflag [#allocation3], %s164_s28  ;;  %s180_s9 = int_to_ptr.vmem [resolvable:$true] %s179_s9 }
  0x22   : > { %593 = dma.hbm_to_vmem [thread:$0]  (!%p934_p0), %s178_s29, 128, %s180_s9, %s165_s11  }
  0x23   : > { %s219_s5 = sshll.u32 %s217_s23, 4  ;;  %s211_s21 = scalar_lea.vmem [#allocation7], %s569_s30  ;;  %s220_s5 = int_to_ptr.hbm [resolvable:$true] %s219_s5 }
  0x24   : > { %s221_s22 = sshll.u32 %s211_s21, 4  ;;  %230 = sbr.rel (%p949_p3) target bundleno = 316 (0x13c), region = 32  ;;  %s222_s22 = int_to_ptr.vmem [resolvable:$true] %s221_s22 }
  0x25   : > { %599 = dma.hbm_to_vmem [thread:$0]  (!%p934_p0), %s220_s5, 32, %s222_s22, %s187_s19  }
  0x26   : > { %s964_s1 = sand.u32 (!%p949_p3), 1, %s824_s13  }
  0x27   : > { %s574_s26 = sshll.u32 (!%p949_p3), %s964_s1, 3  ;;  %s233_s28 = scalar_lea.sflag (!%p949_p3), [#allocation3], %s964_s1 }
  0x28   : > { %s236_s6 = scalar_lea.vmem (!%p949_p3), [#allocation2], %s574_s26 }
  0x29   : > { %807 = dma.done.wait (%p913_p8), %s233_s28, 128  }
  0x2a   : > { %809 = vsyncadd (%p913_p8), %s233_s28, 4294967168  ;;  %s242_s20 = sand.u32 1, %s893_s18   ;;  %s575_s30 = sshll.u32 %s964_s1, 1 }
  0x2b   : > { %s243_s4 = scalar_lea.sflag [#allocation6], %s242_s20  ;;  %s246_s19 = scalar_lea.vmem [#allocation5], %s575_s30 }
  0x2c   : > { %811 = dma.done.wait (%p913_p8), %s243_s4, 64  }
  0x2d   : > { %813 = vsyncadd (%p913_p8), %s243_s4, 4294967232  ;;  %v292_v0 = vld [vmem:[%s236_s6] sm:$0xff]  ;;  %vm300_vm0 = vcmask 1043456   ;;  %v347_v22 = vlaneseq  ;;  %v293_v23 = vld [vmem:[%s246_s19] sm:$0x3]  ;;  %s256_s18 = scalar_lea.vmem [#allocation7], %s575_s30  ;;  %s433_s7 = scalar_lea.hbm %s1031_s3, %s832_s15 }
  0x2e   : > { %295 = vst [vmem:[#allocation1] ss:$2 sm:$0xff] %v292_v0  ;;  %v349_v31 = vperm.slane %v293_v23, 0  ;;  %v350_v32 = vperm.slane %v293_v23, 1  ;;  %vm408_vm3 = vcmask 1040384   ;;  %s288_s8 = scalar_lea.vmem [#allocation8], %s964_s1 }
  0x2f   : > { %v348_v28 = vshrl.u32 %v347_v22, 7  ;;  %s435_s10 = sshll.u32 %s288_s8, 4  ;;  %s437_s29 = sshll.u32 %s433_s7, 4  ;;  %s436_s10 = int_to_ptr.vmem [resolvable:$true] %s435_s10  ;;  %s438_s29 = int_to_ptr.hbm [resolvable:$true] %s437_s29 }
  0x30   : > { %s424_s11 = scalar_lea.sflag [#allocation4], %s964_s1  ;;  %s768_s5 = sshra.s32 %s438_s29, 4  ;;  %s769_s5 = int_to_ptr.hbm [resolvable:$true] %s768_s5 }
  0x31   : > { %vm351_vm1 = vcmp.eq.s32.totalorder %v348_v28, %v349_v31  ;;  %vm352_vm2 = vcmp.eq.s32.totalorder %v348_v28, %v350_v32  ;;  %s770_s21 = scalar_lea.hbm %s769_s5, 1  ;;  %s774_s15 = scalar_lea.hbm %s1031_s3, 2 }
  0x32   : > { %p771_p4 = scmp.ne.s32.totalorder %s769_s5, %s770_s21  ;;  %p775_p7 = scmp.lt.s32.totalorder %s769_s5, %s1031_s3 }
  0x33   : > { %p776_p8 = scmp.lt.s32.totalorder %s774_s15, %s770_s21 }
  0x34   : > { %p772_p5 = pnand %p771_p4, %p917_p9 }
  0x35   : > { %v296_v1 = vld.sshfl [vmem:[#allocation1] sm:$0xff pattern:$0x75316420]  ;;  %v297_v2 = vld.sshfl [vmem:[#allocation1 + $0x8] sm:$0xff pattern:$0x75316420]  ;;  %p777_p10 = por %p776_p8, %p775_p7 }
  0x36   : > { %v301_v3 = vsel %vm300_vm0, %v296_v1, -inf  ;;  %v308_v4 = vsel %vm300_vm0, %v297_v2, -inf  ;;  %p773_p6 = pneg %p772_p5 }
  0x37   : > { %v302_v5 = vrot.slane %v301_v3, 4  ;;  %v309_v6 = vrot.slane %v308_v4, 4 }
  0x38   : > { %p778_p13 = pnand %p777_p10, %p773_p6 }
  0x39   : > { %v303_v7 = vmax.f32 %v301_v3, %v302_v5  ;;  %v310_v8 = vmax.f32 %v308_v4, %v309_v6  ;;  %v381_v5 = vld [vmem:[%s256_s18] sm:$0x3] }
  0x3a   : > { %v383_v6 = vperm.slane %v381_v5, 0 }
  0x3b   : > { %v304_v9 = vrot.slane %v303_v7, 2  ;;  %v311_v10 = vrot.slane %v310_v8, 2 }
  0x3d   : > { %v305_v11 = vmax.f32 %v303_v7, %v304_v9  ;;  %v312_v12 = vmax.f32 %v310_v8, %v311_v10  ;;  %v384_v8 = vperm.slane %v381_v5, 1 }
  0x3f   : > { %v306_v13 = vrot.slane %v305_v11, 1  ;;  %v313_v14 = vrot.slane %v312_v12, 1 }
  0x41   : > { %v307_v15 = vmax.f32 %v305_v11, %v306_v13  ;;  %v314_v16 = vmax.f32 %v312_v12, %v313_v14 }
  0x43   : > { %v317_v17 = vrot.slane %v314_v16, 4 }
  0x45   : > { %v318_v18 = vsel %vm300_vm0, %v307_v15, %v317_v17 }
  0x46   : > { %v320_v19 = vsub.f32 %v292_v0, %v318_v18 }
  0x48   : > { %v321_v20 = vmul.f32 1.442695, %v320_v19 }
  0x4a   : > { %654 = vpow2.f32 %v321_v20 }
  0x50   : > { %v655_v21 = vpop.eup %654 }
  0x51   : > { %324 = vst [vmem:[#allocation1] ss:$2 sm:$0xff] %v655_v21 }
  0x58   : > { %v325_v24 = vld.sshfl [vmem:[#allocation1] sm:$0xff pattern:$0x75316420]  ;;  %v326_v25 = vld.sshfl [vmem:[#allocation1 + $0x8] sm:$0xff pattern:$0x75316420] }
  0x59   : > { %v329_v26 = vsel %vm300_vm0, %v325_v24, 0.0  ;;  %v336_v27 = vsel %vm300_vm0, %v326_v25, 0.0  ;;  %354 = vst [vmem:[#allocation1] ss:$2 sm:$0xff] %v320_v19 }
  0x5a   : > { %v330_v29 = vrot.slane %v329_v26, 4  ;;  %v337_v30 = vrot.slane %v336_v27, 4 }
  0x5c   : > { %v331_v33 = vadd.f32 %v330_v29, %v329_v26  ;;  %v338_v34 = vadd.f32 %v337_v30, %v336_v27 }
  0x5e   : > { %v332_v35 = vrot.slane %v331_v33, 2  ;;  %v339_v36 = vrot.slane %v338_v34, 2 }
  0x60   : > { %v333_v37 = vadd.f32 %v332_v35, %v331_v33  ;;  %v340_v38 = vadd.f32 %v339_v36, %v338_v34  ;;  %v355_v39 = vld.sshfl [vmem:[#allocation1] sm:$0xff pattern:$0x75316420]  ;;  %v356_v40 = vld.sshfl [vmem:[#allocation1 + $0x8] sm:$0xff pattern:$0x75316420] }
  0x61   : > { %v359_v41 = vsel %vm351_vm1, %v355_v39, 0.0  ;;  %v360_v42 = vsel %vm352_vm2, %v356_v40, 0.0 }
  0x62   : > { %v334_v43 = vrot.slane %v333_v37, 1  ;;  %v341_v44 = vrot.slane %v340_v38, 1  ;;  %v361_v45 = vsel %vm300_vm0, %v359_v41, 0.0  ;;  %v368_v46 = vsel %vm300_vm0, %v360_v42, 0.0 }
  0x63   : > { %v362_v47 = vrot.slane %v361_v45, 4  ;;  %v369_v48 = vrot.slane %v368_v46, 4 }
  0x64   : > { %v335_v49 = vadd.f32 %v334_v43, %v333_v37  ;;  %v342_v50 = vadd.f32 %v341_v44, %v340_v38 }
  0x65   : > { %v363_v51 = vadd.f32 %v362_v47, %v361_v45  ;;  %v370_v52 = vadd.f32 %v369_v48, %v368_v46 }
  0x66   : > { %656 = vlog2.f32 %v335_v49 }
  0x67   : > { %658 = vlog2.f32 %v342_v50  ;;  %v364_v53 = vrot.slane %v363_v51, 2  ;;  %v371_v54 = vrot.slane %v370_v52, 2 }
  0x69   : > { %v365_v55 = vadd.f32 %v364_v53, %v363_v51  ;;  %v372_v56 = vadd.f32 %v371_v54, %v370_v52 }
  0x6b   : > { %v366_v57 = vrot.slane %v365_v55, 1  ;;  %v373_v58 = vrot.slane %v372_v56, 1 }
  0x6c   : > { %v657_v59 = vpop.eup %656 }
  0x6d   : > { %v659_v60 = vpop.eup %658  ;;  %v344_v61 = vmul.f32 0.6931472, %v657_v59  ;;  %v367_v62 = vadd.f32 %v366_v57, %v365_v55  ;;  %v374_v63 = vadd.f32 %v373_v58, %v372_v56 }
  0x6e   : > { %v346_v0 = vmul.f32 0.6931472, %v659_v60 }
  0x6f   : > { %v375_v1 = vsub.f32 %v367_v62, %v344_v61 }
  0x70   : > { %v376_v2 = vsub.f32 %v374_v63, %v346_v0 }
  0x71   : > { %v377_v3 = vmul.f32 1.442695, %v375_v1  ;;  %v387_v12 = vmul.f32 %v383_v6, %v375_v1 }
  0x72   : > { %v379_v4 = vmul.f32 1.442695, %v376_v2  ;;  %v388_v14 = vmul.f32 %v384_v8, %v376_v2 }
  0x73   : > { %660 = vpow2.f32 %v377_v3 }
  0x74   : > { %662 = vpow2.f32 %v379_v4 }
  0x79   : > { %v661_v7 = vpop.eup %660 }
  0x7a   : > { %v663_v9 = vpop.eup %662  ;;  %v389_v10 = vsub.f32 1.0, %v661_v7 }
  0x7b   : > { %v390_v11 = vsub.f32 1.0, %v663_v9 }
  0x7c   : > { %v391_v13 = vmul.f32 %v389_v10, %v389_v10 }
  0x7d   : > { %v392_v15 = vmul.f32 %v390_v11, %v390_v11 }
  0x7e   : > { %v393_v16 = vsub.f32 0.0, %v391_v13 }
  0x7f   : > { %v394_v17 = vsub.f32 0.0, %v392_v15 }
  0x80   : > { %v395_v18 = vmul.f32 %v393_v16, %v387_v12 }
  0x81   : > { %v396_v19 = vmul.f32 %v394_v17, %v388_v14 }
  0x82   : > { %v409_v20 = vsel %vm408_vm3, %v395_v18, 0.0 }
  0x83   : > { %v410_v21 = vsel %vm408_vm3, %v396_v19, 0.0 }
  0x84   : > { %v411_v22 = vadd.f32 %v410_v21, %v409_v20 }
  0x86   : > { %412 = vadd.xlane.f32.xlu0 %v411_v22 }
  0xf9   : > { %v413_v23 = vpop.xlane.xlu0 %412 }
  0xfa   : > { %v414_v24 = vrot.slane %v413_v23, 4 }
  0xfc   : > { %v415_v25 = vadd.f32 %v414_v24, %v413_v23 }
  0xfe   : > { %v416_v26 = vrot.slane %v415_v25, 2 }
 0x100   : > { %v417_v27 = vadd.f32 %v416_v26, %v415_v25 }
 0x102   : > { %v418_v28 = vrot.slane %v417_v27, 1 }
 0x104   : > { %v419_v29 = vadd.f32 %v418_v28, %v417_v27 }
 0x106   : > { %580 = vpush %v419_v29 }
 0x137   : > { %s581_s9 = spop %580 }
 0x138   : > { %v421_v30 = vstv %s581_s9 }
 0x139   : > { %422 = vst [vmem:[%s288_s8] sm:$0x1] %v421_v30 }
 0x13a   : > { %781 = shalt.err (!%p778_p13)
}
 0x13b   : > { %588 = dma.vmem_to_hbm [thread:$0]  (%p917_p9), %s436_s10, 16, %s438_s29, %s424_s11  }
 0x13c PF: > { %s449_s1 = sand.u32 1, %s820_s12   ;;  %p601_p0 = pnand %p565_p12, %p924_p11 }
 0x13d   : > { %s450_s20 = scalar_lea.sflag [#allocation4], %s449_s1 }
 0x13e   : > { %p602_p1 = pneg %p601_p0 }
 0x140   : > { %815 = dma.done.wait (%p602_p1), %s450_s20, 16  }
 0x141   : > { %817 = vsyncadd (%p602_p1), %s450_s20, 4294967280  ;;  %s22_s17 = sadd.s32 1, %s840_s17   ;;  %s1043_s30 = sld [smem:[#allocation13_spill]] }
 0x142   : > { %p19_p2 = scmp.ge.s32.totalorder %s22_s17, 4   ;;  %s1044_s25 = sld [smem:[#allocation12_spill]] }
 0x143   : > { %s1045_s12 = smov %s824_s13  ;;  %s1046_s13 = smov %s828_s14 }
 0x144   : > { %s1048_s15 = smov %s836_s16  ;;  %21 = sbr.rel (!%p19_p2) target bundleno = 10 (0xa), region = 101 }
 0x147   : > { %s1047_s14 = smov %s1043_s30 }
 0x148   : > { %s1049_s16 = smov %s1044_s25 }
 0x149   :  { %455 = vsyncpa [#allocation3], 1 }
 0x14a   :  { %457 = vsyncpa [#allocation3 + $0x1], 1 }
 0x14b   :  { %458 = vsyncpa [#allocation6], 1 }
 0x14c   :  { %460 = vsyncpa [#allocation6 + $0x1], 1 }
 0x14d   :  { %461 = vsyncpa [#allocation4], 1 }
 0x14e   :  { %463 = vsyncpa [#allocation4 + $0x1], 1 }

</bundles_post_ra>
